<compile_context>
chip_gen: v6e
topology: v6e:2x2x1
jax: 0.10.0
libtpu: 0.0.40
codegen_flags: <defaults>
</compile_context>

<pallas_src>
import math
import functools

import jax
import jax.numpy as jnp
from jax.experimental import pallas as pl
from jax.experimental.pallas import tpu as pltpu

_LANE = 128
_ACC_ROWS = 8                 # vreg sublane count; accumulator tile rows
_NCORES = 2                   # leading "parallel" grid axis (v7x: 2 TCs)
_DEFAULT_BLOCK_ROWS = 1024    # (1024, 128) f32 block = 512 KiB per buffer


# ---------------------------------------------------------------------------
# Pallas kernel factory
# ---------------------------------------------------------------------------
def _fold_to_acc(v, block_rows):
    """(block_rows, 128) -> (8, 128) via vreg-wise adds (no cross-lane XLU)."""
    return v.reshape(block_rows // _ACC_ROWS, _ACC_ROWS, _LANE).sum(axis=0)


def _make_reduce_kernel(elem_fn, n_inputs, rows, block_rows, nblocks, bpc):
    """Builds a kernel accumulating sum(elem_fn(*inputs)) into (8,128) partials.

    Grid is (ncores, blocks_per_core); block id = c * bpc + s. Blocks with
    id >= nblocks (only possible when nblocks is odd) are clamped by the
    index_map and skipped here. If the last real block is partial, rows
    beyond `rows` are masked out with a select (garbage-safe).
    """
    masked = (rows % block_rows) != 0

    def kernel(*refs):
        in_refs = refs[:n_inputs]
        out_ref = refs[n_inputs]
        acc_ref = refs[n_inputs + 1]

        c = pl.program_id(0)
        s = pl.program_id(1)
        bid = c * bpc + s

        @pl.when(s == 0)
        def _():
            acc_ref[...] = jnp.zeros_like(acc_ref)

        @pl.when(bid < nblocks)
        def _():
            v = elem_fn(*[r[...].astype(jnp.float32) for r in in_refs])
            if masked:
                @pl.when(bid == nblocks - 1)
                def _():
                    row = (jax.lax.broadcasted_iota(
                        jnp.int32, (block_rows, _LANE), 0)
                        + bid * block_rows)
                    vm = jnp.where(row < rows, v, 0.0)
                    acc_ref[...] += _fold_to_acc(vm, block_rows)

                @pl.when(bid != nblocks - 1)
                def _():
                    acc_ref[...] += _fold_to_acc(v, block_rows)
            else:
                acc_ref[...] += _fold_to_acc(v, block_rows)

        @pl.when(s == bpc - 1)
        def _():
            out_ref[...] = acc_ref[...]

    return kernel


# ---------------------------------------------------------------------------
# Wrapper: tiled global reduction sum(elem_fn(*arrays))
# ---------------------------------------------------------------------------
def _tiled_reduce_sum(elem_fn, arrays, block_rows=_DEFAULT_BLOCK_ROWS):
    flats = [a.reshape(-1) for a in arrays]          # bitcast, free
    n = flats[0].shape[0]
    rows = n // _LANE
    br = min(block_rows, (rows // _ACC_ROWS) * _ACC_ROWS)

    if br == 0:
        # Tiny input (< 1024 elements): kernel launch costs more than the work.
        return jnp.sum(elem_fn(*[f.astype(jnp.float32) for f in flats]))

    main_n = rows * _LANE
    if main_n == n:
        mains = [f.reshape(rows, _LANE) for f in flats]
    else:
        mains = [f[:main_n].reshape(rows, _LANE) for f in flats]

    nblocks = pl.cdiv(rows, br)
    ncores = _NCORES if nblocks >= _NCORES else 1
    bpc = pl.cdiv(nblocks, ncores)
    need_clamp = (ncores * bpc) != nblocks

    def in_map(c, s):
        bid = c * bpc + s
        if need_clamp:
            bid = jnp.where(bid < nblocks, bid, nblocks - 1)
        return (bid, 0)

    kernel = _make_reduce_kernel(elem_fn, len(arrays), rows, br, nblocks, bpc)

    partials = pl.pallas_call(
        kernel,
        out_shape=jax.ShapeDtypeStruct((ncores * _ACC_ROWS, _LANE),
                                       jnp.float32),
        grid_spec=pltpu.PrefetchScalarGridSpec(
            num_scalar_prefetch=0,
            grid=(ncores, bpc),
            in_specs=[pl.BlockSpec((br, _LANE), in_map) for _ in arrays],
            out_specs=pl.BlockSpec((_ACC_ROWS, _LANE), lambda c, s: (c, 0)),
            scratch_shapes=[pltpu.VMEM((_ACC_ROWS, _LANE), jnp.float32)],
        ),
        compiler_params=pltpu.CompilerParams(
            dimension_semantics=("parallel", "arbitrary")),
    )(*mains)

    total = jnp.sum(partials)
    if main_n != n:
        # < 128-element lane remainder: fold in with plain JAX (no big pad).
        tails = [f[main_n:].astype(jnp.float32) for f in flats]
        total = total + jnp.sum(elem_fn(*tails))
    return total


def _sq_err_sum(a, b):
    return _tiled_reduce_sum(lambda x, y: (x - y) * (x - y), (a, b))


def _log_sum(x):
    return _tiled_reduce_sum(jnp.log, (x,))


# ---------------------------------------------------------------------------
# RateDistortionLoss forward
# ---------------------------------------------------------------------------
@functools.partial(jax.jit, static_argnames=("only_dist",))
def rate_distortion_loss(x_hat, target, y_likelihoods, z_likelihoods,
                         lmbda=0.01, only_dist=False):
    """Equivalent of RateDistortionLoss(lmbda, metric='mse').forward(...)."""
    N, C, H, W = target.shape
    num_elems = N * C * H * W
    num_pixels = N * H * W

    # --- distortion (MSE) --------------------------------------------------
    sq_err = _sq_err_sum(x_hat, target)
    mse_loss = sq_err / jnp.float32(num_elems)
    distortion = jnp.float32(255.0 ** 2) * mse_loss

    # --- rate (bpp) --------------------------------------------------------
    neg_log2_np = jnp.float32(-math.log(2) * num_pixels)
    y_bpp = _log_sum(y_likelihoods) / neg_log2_np
    z_bpp = _log_sum(z_likelihoods) / neg_log2_np
    bpp_loss = y_bpp + z_bpp

    out = {
        "mse_loss": mse_loss,
        "y_bpp": y_bpp,
        "z_bpp": z_bpp,
        "bpp_loss": bpp_loss,
    }
    if not only_dist:
        out["loss"] = jnp.float32(lmbda) * distortion + bpp_loss
    else:
        out["loss"] = distortion
    return out


# ---------------------------------------------------------------------------
# Main
# ---------------------------------------------------------------------------
if __name__ == "__main__":
    key = jax.random.PRNGKey(0)
    k1, k2, k3, k4 = jax.random.split(key, 4)

    # Small image-compression-like shapes (NCHW).
    N, C, H, W = 2, 3, 16, 16
    x_hat = jax.random.uniform(k1, (N, C, H, W), dtype=jnp.float32)
    target = jax.random.uniform(k2, (N, C, H, W), dtype=jnp.float32)
    # Likelihoods in (0, 1]. y takes the Pallas path; z is tiny and takes the
    # plain-JAX fallback path.
    y_lik = jax.random.uniform(k3, (N, 16, 8, 8), dtype=jnp.float32,
                               minval=0.05, maxval=1.0)
    z_lik = jax.random.uniform(k4, (N, 8, 4, 4), dtype=jnp.float32,
                               minval=0.05, maxval=1.0)

    out = rate_distortion_loss(x_hat, target, y_lik, z_lik, lmbda=0.01)
    out = jax.tree_util.tree_map(jax.block_until_ready, out)

    # Pure-JAX reference check (not part of the kernel hot path).
    mse_ref = jnp.mean((x_hat - target) ** 2)
    num_pixels = N * H * W
    y_bpp_ref = jnp.sum(jnp.log(y_lik)) / (-math.log(2) * num_pixels)
    z_bpp_ref = jnp.sum(jnp.log(z_lik)) / (-math.log(2) * num_pixels)
    loss_ref = 0.01 * (255.0 ** 2) * mse_ref + y_bpp_ref + z_bpp_ref

    assert jnp.allclose(out["mse_loss"], mse_ref, rtol=1e-5, atol=1e-6)
    assert jnp.allclose(out["y_bpp"], y_bpp_ref, rtol=1e-5, atol=1e-6)
    assert jnp.allclose(out["z_bpp"], z_bpp_ref, rtol=1e-5, atol=1e-6)
    assert jnp.allclose(out["bpp_loss"], y_bpp_ref + z_bpp_ref,
                        rtol=1e-5, atol=1e-6)
    assert jnp.allclose(out["loss"], loss_ref, rtol=1e-5, atol=1e-6)

    print("KERNEL_OK")
</pallas_src>

<mosaic_0001>
module attributes {stable_mosaic.version = 11 : i64} {
  func.func @kernel(%arg0: i32, %arg1: i32, %arg2: memref<16x128xf32, #tpu.memory_space<vmem>>, %arg3: memref<8x128xf32, #tpu.memory_space<vmem>>, %arg4: memref<8x128xf32, #tpu.memory_space<vmem>>) attributes {dimension_semantics = [#tpu.dimension_semantics<parallel>, #tpu.dimension_semantics<arbitrary>], iteration_bounds = array<i64: 1, 1>, scalar_prefetch = 0 : i64, scratch_operands = 1 : i64, tpu.core_type = #tpu.core_type<tc>, window_params = [{transform_indices = @transform_0, window_bounds = array<i64: 16, 128>}, {transform_indices = @transform_1, window_bounds = array<i64: 8, 128>}]} {
    %c1_i32 = arith.constant 1 : i32
    %0 = arith.muli %arg0, %c1_i32 : i32
    %1 = arith.addi %0, %arg1 : i32
    %c0_i32 = arith.constant 0 : i32
    %2 = arith.cmpi eq, %arg1, %c0_i32 : i32
    %3 = arith.extui %2 : i1 to i32
    %c0_i32_0 = arith.constant 0 : i32
    %4 = arith.cmpi ne, %3, %c0_i32_0 : i32
    scf.if %4 {
      %cst = arith.constant 0.000000e+00 : f32
      %11 = vector.broadcast %cst : f32 to vector<8x128xf32>
      %c0 = arith.constant 0 : index
      %c0_5 = arith.constant 0 : index
      %12 = vector.load %arg4[%c0, %c0_5] : memref<8x128xf32, #tpu.memory_space<vmem>>, vector<8x128xf32>
      tpu.vector_store %arg4[%c0, %c0_5], %11 {strides = array<i32>} : memref<8x128xf32, #tpu.memory_space<vmem>>, vector<8x128xf32>,
    } else {
    }
    %c1_i32_1 = arith.constant 1 : i32
    %5 = arith.cmpi slt, %1, %c1_i32_1 : i32
    %6 = arith.extui %5 : i1 to i32
    %c0_i32_2 = arith.constant 0 : i32
    %7 = arith.cmpi ne, %6, %c0_i32_2 : i32
    scf.if %7 {
      %c0 = arith.constant 0 : index
      %c0_5 = arith.constant 0 : index
      %11 = vector.load %arg2[%c0, %c0_5] : memref<16x128xf32, #tpu.memory_space<vmem>>, vector<16x128xf32>
      %12 = math.log %11 : vector<16x128xf32>
      %c0_6 = arith.constant 0 : index
      %c0_7 = arith.constant 0 : index
      %13 = vector.load %arg4[%c0_6, %c0_7] : memref<8x128xf32, #tpu.memory_space<vmem>>, vector<8x128xf32>
      %14 = vector.shape_cast %12 : vector<16x128xf32> to vector<2x8x128xf32>
      %cst = arith.constant dense<0.000000e+00> : vector<8x128xf32>
      %15 = vector.multi_reduction <add>, %14, %cst [0] : vector<2x8x128xf32> to vector<8x128xf32>
      %16 = arith.addf %13, %15 : vector<8x128xf32>
      %c0_8 = arith.constant 0 : index
      %c0_9 = arith.constant 0 : index
      %17 = vector.load %arg4[%c0_8, %c0_9] : memref<8x128xf32, #tpu.memory_space<vmem>>, vector<8x128xf32>
      tpu.vector_store %arg4[%c0_8, %c0_9], %16 {strides = array<i32>} : memref<8x128xf32, #tpu.memory_space<vmem>>, vector<8x128xf32>,
    } else {
    }
    %c0_i32_3 = arith.constant 0 : i32
    %8 = arith.cmpi eq, %arg1, %c0_i32_3 : i32
    %9 = arith.extui %8 : i1 to i32
    %c0_i32_4 = arith.constant 0 : i32
    %10 = arith.cmpi ne, %9, %c0_i32_4 : i32
    scf.if %10 {
      %c0 = arith.constant 0 : index
      %c0_5 = arith.constant 0 : index
      %11 = vector.load %arg4[%c0, %c0_5] : memref<8x128xf32, #tpu.memory_space<vmem>>, vector<8x128xf32>
      %c0_6 = arith.constant 0 : index
      %c0_7 = arith.constant 0 : index
      %12 = vector.load %arg3[%c0_6, %c0_7] : memref<8x128xf32, #tpu.memory_space<vmem>>, vector<8x128xf32>
      tpu.vector_store %arg3[%c0_6, %c0_7], %11 {strides = array<i32>} : memref<8x128xf32, #tpu.memory_space<vmem>>, vector<8x128xf32>,
    } else {
    }
    return
  }
  func.func @transform_0(%arg0: i32, %arg1: i32) -> (i32, i32) {
    %c1_i32 = arith.constant 1 : i32
    %0 = arith.muli %arg0, %c1_i32 : i32
    %1 = arith.addi %0, %arg1 : i32
    %c0_i32 = arith.constant 0 : i32
    %c0_i32_0 = arith.constant 0 : i32
    return %1, %c0_i32 : i32, i32
  }
  func.func @transform_1(%arg0: i32, %arg1: i32) -> (i32, i32) {
    %c0_i32 = arith.constant 0 : i32
    %c0_i32_0 = arith.constant 0 : i32
    return %arg0, %c0_i32 : i32, i32
  }
}

module attributes {stable_mosaic.version = 11 : i64} {
  func.func @kernel(%arg0: i32, %arg1: i32, %arg2: memref<8x128xf32, #tpu.memory_space<vmem>>, %arg3: memref<8x128xf32, #tpu.memory_space<vmem>>, %arg4: memref<8x128xf32, #tpu.memory_space<vmem>>, %arg5: memref<8x128xf32, #tpu.memory_space<vmem>>) attributes {dimension_semantics = [#tpu.dimension_semantics<parallel>, #tpu.dimension_semantics<arbitrary>], iteration_bounds = array<i64: 2, 1>, scalar_prefetch = 0 : i64, scratch_operands = 1 : i64, tpu.core_type = #tpu.core_type<tc>, window_params = [{transform_indices = @transform_0, window_bounds = array<i64: 8, 128>}, {transform_indices = @transform_1, window_bounds = array<i64: 8, 128>}, {transform_indices = @transform_2, window_bounds = array<i64: 8, 128>}]} {
    %c1_i32 = arith.constant 1 : i32
    %0 = arith.muli %arg0, %c1_i32 : i32
    %1 = arith.addi %0, %arg1 : i32
    %c0_i32 = arith.constant 0 : i32
    %2 = arith.cmpi eq, %arg1, %c0_i32 : i32
    %3 = arith.extui %2 : i1 to i32
    %c0_i32_0 = arith.constant 0 : i32
    %4 = arith.cmpi ne, %3, %c0_i32_0 : i32
    scf.if %4 {
      %cst = arith.constant 0.000000e+00 : f32
      %11 = vector.broadcast %cst : f32 to vector<8x128xf32>
      %c0 = arith.constant 0 : index
      %c0_4 = arith.constant 0 : index
      %12 = vector.load %arg5[%c0, %c0_4] : memref<8x128xf32, #tpu.memory_space<vmem>>, vector<8x128xf32>
      tpu.vector_store %arg5[%c0, %c0_4], %11 {strides = array<i32>} : memref<8x128xf32, #tpu.memory_space<vmem>>, vector<8x128xf32>,
    } else {
    }
    %c2_i32 = arith.constant 2 : i32
    %5 = arith.cmpi slt, %1, %c2_i32 : i32
    %6 = arith.extui %5 : i1 to i32
    %c0_i32_1 = arith.constant 0 : i32
    %7 = arith.cmpi ne, %6, %c0_i32_1 : i32
    scf.if %7 {
      %c0 = arith.constant 0 : index
      %c0_4 = arith.constant 0 : index
      %11 = vector.load %arg2[%c0, %c0_4] : memref<8x128xf32, #tpu.memory_space<vmem>>, vector<8x128xf32>
      %c0_5 = arith.constant 0 : index
      %c0_6 = arith.constant 0 : index
      %12 = vector.load %arg3[%c0_5, %c0_6] : memref<8x128xf32, #tpu.memory_space<vmem>>, vector<8x128xf32>
      %13 = arith.subf %11, %12 : vector<8x128xf32>
      %14 = arith.subf %11, %12 : vector<8x128xf32>
      %15 = arith.mulf %13, %14 : vector<8x128xf32>
      %c1_i32_7 = arith.constant 1 : i32
      %16 = arith.cmpi eq, %1, %c1_i32_7 : i32
      %17 = arith.extui %16 : i1 to i32
      %c0_i32_8 = arith.constant 0 : i32
      %18 = arith.cmpi ne, %17, %c0_i32_8 : i32
      scf.if %18 {
        %22 = tpu.iota {dimensions = array<i32: 0>} : vector<8x128xi32>
        %c8_i32 = arith.constant 8 : i32
        %23 = arith.muli %1, %c8_i32 : i32
        %24 = vector.broadcast %23 : i32 to vector<8x128xi32>
        %25 = arith.addi %22, %24 : vector<8x128xi32>
        %c12_i32 = arith.constant 12 : i32
        %26 = vector.broadcast %c12_i32 : i32 to vector<8x128xi32>
        %27 = arith.cmpi slt, %25, %26 : vector<8x128xi32>
        %cst = arith.constant 0.000000e+00 : f32
        %28 = vector.broadcast %cst : f32 to vector<8x128xf32>
        %29 = arith.select %27, %15, %28 : vector<8x128xi1>, vector<8x128xf32>
        %c0_11 = arith.constant 0 : index
        %c0_12 = arith.constant 0 : index
        %30 = vector.load %arg5[%c0_11, %c0_12] : memref<8x128xf32, #tpu.memory_space<vmem>>, vector<8x128xf32>
        %31 = vector.shape_cast %29 : vector<8x128xf32> to vector<1x8x128xf32>
        %cst_13 = arith.constant dense<0.000000e+00> : vector<8x128xf32>
        %32 = vector.multi_reduction <add>, %31, %cst_13 [0] : vector<1x8x128xf32> to vector<8x128xf32>
        %33 = arith.addf %30, %32 : vector<8x128xf32>
        %c0_14 = arith.constant 0 : index
        %c0_15 = arith.constant 0 : index
        %34 = vector.load %arg5[%c0_14, %c0_15] : memref<8x128xf32, #tpu.memory_space<vmem>>, vector<8x128xf32>
        tpu.vector_store %arg5[%c0_14, %c0_15], %33 {strides = array<i32>} : memref<8x128xf32, #tpu.memory_space<vmem>>, vector<8x128xf32>,
      } else {
      }
      %c1_i32_9 = arith.constant 1 : i32
      %19 = arith.cmpi ne, %1, %c1_i32_9 : i32
      %20 = arith.extui %19 : i1 to i32
      %c0_i32_10 = arith.constant 0 : i32
      %21 = arith.cmpi ne, %20, %c0_i32_10 : i32
      scf.if %21 {
        %c0_11 = arith.constant 0 : index
        %c0_12 = arith.constant 0 : index
        %22 = vector.load %arg5[%c0_11, %c0_12] : memref<8x128xf32, #tpu.memory_space<vmem>>, vector<8x128xf32>
        %23 = vector.shape_cast %15 : vector<8x128xf32> to vector<1x8x128xf32>
        %cst = arith.constant dense<0.000000e+00> : vector<8x128xf32>
        %24 = vector.multi_reduction <add>, %23, %cst [0] : vector<1x8x128xf32> to vector<8x128xf32>
        %25 = arith.addf %22, %24 : vector<8x128xf32>
        %c0_13 = arith.constant 0 : index
        %c0_14 = arith.constant 0 : index
        %26 = vector.load %arg5[%c0_13, %c0_14] : memref<8x128xf32, #tpu.memory_space<vmem>>, vector<8x128xf32>
        tpu.vector_store %arg5[%c0_13, %c0_14], %25 {strides = array<i32>} : memref<8x128xf32, #tpu.memory_space<vmem>>, vector<8x128xf32>,
      } else {
      }
    } else {
    }
    %c0_i32_2 = arith.constant 0 : i32
    %8 = arith.cmpi eq, %arg1, %c0_i32_2 : i32
    %9 = arith.extui %8 : i1 to i32
    %c0_i32_3 = arith.constant 0 : i32
    %10 = arith.cmpi ne, %9, %c0_i32_3 : i32
    scf.if %10 {
      %c0 = arith.constant 0 : index
      %c0_4 = arith.constant 0 : index
      %11 = vector.load %arg5[%c0, %c0_4] : memref<8x128xf32, #tpu.memory_space<vmem>>, vector<8x128xf32>
      %c0_5 = arith.constant 0 : index
      %c0_6 = arith.constant 0 : index
      %12 = vector.load %arg4[%c0_5, %c0_6] : memref<8x128xf32, #tpu.memory_space<vmem>>, vector<8x128xf32>
      tpu.vector_store %arg4[%c0_5, %c0_6], %11 {strides = array<i32>} : memref<8x128xf32, #tpu.memory_space<vmem>>, vector<8x128xf32>,
    } else {
    }
    return
  }
  func.func @transform_0(%arg0: i32, %arg1: i32) -> (i32, i32) {
    %c1_i32 = arith.constant 1 : i32
    %0 = arith.muli %arg0, %c1_i32 : i32
    %1 = arith.addi %0, %arg1 : i32
    %c0_i32 = arith.constant 0 : i32
    %c0_i32_0 = arith.constant 0 : i32
    return %1, %c0_i32 : i32, i32
  }
  func.func @transform_1(%arg0: i32, %arg1: i32) -> (i32, i32) {
    %c1_i32 = arith.constant 1 : i32
    %0 = arith.muli %arg0, %c1_i32 : i32
    %1 = arith.addi %0, %arg1 : i32
    %c0_i32 = arith.constant 0 : i32
    %c0_i32_0 = arith.constant 0 : i32
    return %1, %c0_i32 : i32, i32
  }
  func.func @transform_2(%arg0: i32, %arg1: i32) -> (i32, i32) {
    %c0_i32 = arith.constant 0 : i32
    %c0_i32_0 = arith.constant 0 : i32
    return %arg0, %c0_i32 : i32, i32
  }
}

</mosaic_0001>

<bundles_post_ra>
// kernel: rate_distortion_loss.3
= control target key start
LH: loop header
LB: loop body
LE: loop exit
PB: predicated region body
PF: predicated region fallthrough
CT: control target
= control target key end

     0   :  { %s88_s0 = inlined_call_operand.vmem [shape: f32[16,128], index: 0, kind: input, shape index: {}]   ;;  %s89_s1 = inlined_call_operand.vmem [shape: f32[8,128], index: 1, kind: output, shape index: {}]  }
   0x1   :  { %v40_v0 = vld [vmem:[%s88_s0] sm:$0xff]  ;;  %v41_v1 = vld [vmem:[%s88_s0 + $0x8] sm:$0xff] }
   0x2   :  { %65 = vlog2.f32 %v40_v0 }
   0x3   :  { %67 = vlog2.f32 %v41_v1 }
   0xf   :  { %v66_v2 = vpop.eup %65 }
  0x10   :  { %v68_v3 = vpop.eup %67  ;;  %v43_v4 = vmul.f32 0.6931472, %v66_v2 }
  0x11   :  { %v45_v5 = vmul.f32 0.6931472, %v68_v3 }
  0x13   :  { %v47_v6 = vadd.f32 %v45_v5, %v43_v4 }
  0x15   :  { %54 = vst [vmem:[%s89_s1] sm:$0xff] %v47_v6 }

// kernel: rate_distortion_loss.2
= control target key start
LH: loop header
LB: loop body
LE: loop exit
PB: predicated region body
PF: predicated region fallthrough
CT: control target
= control target key end

     0   :  { %s376_s9 = smov 0   ;;  %s378_s10 = smov 0   ;;  %s425_s0 = inlined_call_operand.vmem [shape: f32[12,128], index: 0, kind: input, shape index: {}]   ;;  %s426_s1 = inlined_call_operand.vmem [shape: f32[12,128], index: 1, kind: input, shape index: {}]   ;;  %s427_s2 = inlined_call_operand.vmem [shape: f32[16,128], index: 2, kind: output, shape index: {}]  }
   0x1   :  { %s380_s11 = smov 0  }
   0x2 LB: > { %s24_s12 = sadd.s32 1, %s354_s10  ;;  %p301_p0 = scmp.ge.s32.totalorder %s358_s11, 1  ;;  %s358_s11 = sphi %s380_s11, %s12_s11   ;;  %s354_s10 = sphi %s378_s10, %s429_s10   ;;  %s350_s9 = sphi %s376_s9, %s428_s9  }
   0x3   : > { %p26_p1 = scmp.ge.s32.totalorder %s24_s12, 2  ;;  %p140_p2 = scmp.lt.s32.totalorder %s358_s11, 3 }
   0x5   : > { %s431_s12 = smov (%p26_p1, %s24_s12), 0  ;;  %p141_p3 = pnand %p301_p0, %p140_p2 }
   0x6   : > { %p167_p4 = scmp.lt.s32.totalorder (!%p141_p3), %s350_s9, 1  ;;  %p305_p5 = scmp.ge.s32.totalorder (!%p141_p3), %s350_s9, 2 }
   0x7   : > { %144 = sbr.rel (%p141_p3) target bundleno = 53 (0x35), region = 28 }
   0xc   : > { %v360_v0 = vmov 0.0   ;;  %s168_s13 = scalar_select %p167_p4, %s350_s9, 1 }
   0xd   : > { %187 = vst [vmem:[#allocation2] sm:$0xff] %v360_v0  ;;  %191 = sbr.rel (%p305_p5) target bundleno = 45 (0x2d), region = 36  ;;  %p306_p6 = scmp.ne.s32.totalorder (!%p305_p5), %s350_s9, 1 }
   0xe   : > { %s398_s14 = sshll.u32 %s168_s13, 3 }
   0xf   : > { %s170_s17 = scalar_lea.vmem %s425_s0, %s398_s14  ;;  %s176_s20 = scalar_lea.vmem %s426_s1, %s398_s14 }
  0x10   : > { %s181_s23 = scalar_lea.vmem %s427_s2, %s398_s14 }
  0x12   : > { %v192_v1 = vld [vmem:[%s170_s17] sm:$0xff]  ;;  %199 = sbr.rel (%p306_p6) target bundleno = 34 (0x22), region = 40  ;;  %s307_s24 = sshll.u32 (!%p306_p6), %s350_s9, 3 }
  0x13   : > { %v193_v2 = vld [vmem:[%s176_s20] sm:$0xff] }
  0x14   : > { %v194_v3 = vsub.f32 %v192_v1, %v193_v2 }
  0x16   : > { %v195_v4 = vmul.f32 %v194_v3, %v194_v3 }
  0x17   : > { %v200_v5 = vlaneseq  ;;  %v203_v6 = vstv %s307_s24  ;;  %v207_v9 = vld [vmem:[#allocation2] sm:$0xff] }
  0x19   : > { %v201_v7 = vshrl.u32 %v200_v5, 7 }
  0x1b   : > { %v204_v8 = vadd.s32 %v203_v6, %v201_v7 }
  0x1d   : > { %vm205_vm0 = vcmp.lt.s32.totalorder %v204_v8, 12 }
  0x1e   : > { %v206_v10 = vsel %vm205_vm0, %v195_v4, 0.0 }
  0x1f   : > { %v209_v11 = vadd.f32 %v207_v9, %v206_v10 }
  0x21   : > { %210 = vst [vmem:[#allocation2] sm:$0xff] %v209_v11 }
  0x22 PF: > { %p308_p7 = scmp.eq.s32.totalorder %s350_s9, 1 }
  0x24   : > { %214 = sbr.rel (%p308_p7) target bundleno = 45 (0x2d), region = 44 }
  0x29   : > { %v215_v12 = vld [vmem:[#allocation2] sm:$0xff] }
  0x2a   : > { %v217_v13 = vadd.f32 %v215_v12, %v195_v4 }
  0x2c   : > { %218 = vst [vmem:[#allocation2] sm:$0xff] %v217_v13 }
  0x2d PF:  {}
  0x33   : > { %v222_v14 = vld [vmem:[#allocation2] sm:$0xff] }
  0x34   : > { %223 = vst [vmem:[%s181_s23] sm:$0xff] %v222_v14 }
  0x35 PF: > { %s12_s11 = sadd.s32 1, %s358_s11   ;;  %s428_s9 = smov %s354_s10 }
  0x36   : > { %p9_p8 = scmp.ge.s32.totalorder %s12_s11, 4   ;;  %s429_s10 = smov %s431_s12 }
  0x38   :  { %11 = sbr.rel (!%p9_p8) target bundleno = 2 (0x2), region = 81 }

</bundles_post_ra>
